<compile_context>
chip_gen: v7x
topology: tpu7x:2x2x1
jax: 0.10.0
libtpu: 0.0.40
codegen_flags: <defaults>
</compile_context>

<pallas_src>
import math
from functools import partial

import jax
import jax.numpy as jnp
from jax.experimental import pallas as pl
from jax.experimental.pallas import tpu as pltpu


def _round_up(v, m):
    return ((v + m - 1) // m) * m


def _vmem_budget():
    """Generation-aware scoped-VMEM budget in bytes."""
    cap = 128 * 1024 * 1024
    try:
        cap = int(getattr(pltpu.get_tpu_info(), "vmem_capacity_bytes", cap))
    except Exception:
        pass
    # ~3/4 of physical, capped at 96 MiB (v5e/v6e); gives ~48 MiB on v7x.
    return max(32 * 1024 * 1024, min((cap * 3) // 4, 96 * 1024 * 1024))


def _pick_row_tile(total_rows, vmem_bytes_fn, budget):
    """Largest row tile in {512,256,128} dividing total_rows that fits budget.

    Prefers tiles leaving >= 2 grid steps so a 2-TensorCore chip (v7x) can
    shard the parallel axis across cores.
    """
    fitting = [tm for tm in (512, 256, 128)
               if total_rows % tm == 0 and vmem_bytes_fn(tm) <= budget]
    if not fitting:
        return 128
    multi = [tm for tm in fitting if total_rows // tm >= 2]
    return multi[0] if multi else fitting[0]


# --------------------------------------------------------------------------
# Kernel 1: NodeInformationScore + |.|-sum reduction, transposed layout.
#   score[i] = sum_f | (x - A_norm @ x)[i, f] |  with A_norm = D^-1/2 A D^-1/2
# Streams column blocks of A_norm^T (bf16); x^T stays resident (bf16) and is
# sliced in-kernel (no second x stream).  The reduction runs over sublanes so
# the output block (1, tm) is lane-dense -> full unmasked vector stores.
# --------------------------------------------------------------------------
def _info_score_kernel(at_ref, xt_ref, out_ref):
    tm = at_ref.shape[1]
    # prop^T[:, tile] = x^T @ A_norm^T[:, tile] == (A_norm @ x)^T[:, tile]
    prop_t = jnp.dot(xt_ref[...], at_ref[...],
                     preferred_element_type=jnp.float32)         # (c_p, tm) f32
    col0 = pl.multiple_of(pl.program_id(0) * tm, tm)
    xt_tile = xt_ref[:, pl.ds(col0, tm)].astype(jnp.float32)     # identity folded
    out_ref[...] = jnp.sum(jnp.abs(xt_tile - prop_t), axis=0, keepdims=True)


def node_information_score(at_pad, xt_pad):
    """at_pad: (n_p, n_p) bf16 = A_norm^T;  xt_pad: (c_p, n_p) bf16 = x^T."""
    c_p, n_p = xt_pad.shape
    budget = _vmem_budget()

    def vmem_bytes(tm):
        return (2 * n_p * tm * 2       # streamed A_norm^T column tile (bf16), 2-buf
                + 2 * c_p * n_p * 2    # resident x^T (bf16), default double buffer
                + 2 * tm * 4           # lane-dense output tile
                + 3 * c_p * tm * 4)    # in-kernel f32 temporaries
    tm = _pick_row_tile(n_p, vmem_bytes, budget)

    # NOTE: the resident x^T input keeps the default double buffer (the
    # pl.Buffered(1) hint is skipped for lowering safety); its extra
    # c_p*n_p*2 bytes are charged to the budget estimate above instead.
    out = pl.pallas_call(
        _info_score_kernel,
        out_shape=jax.ShapeDtypeStruct((1, n_p), jnp.float32),
        grid=(n_p // tm,),
        in_specs=[
            pl.BlockSpec((n_p, tm), lambda i: (0, i)),
            pl.BlockSpec((c_p, n_p), lambda i: (0, 0)),
        ],
        out_specs=pl.BlockSpec((1, tm), lambda i: (0, i)),
        compiler_params=pltpu.CompilerParams(
            dimension_semantics=("parallel",),
            vmem_limit_bytes=budget),
    )(at_pad, xt_pad)
    return out[0]


# --------------------------------------------------------------------------
# Kernel 2: per-graph structure-learning attention + per-row softmax.
#   s[i, j]  = leaky_relu(u_i + v_j) + lamb * induced_attr[i, j]
#   out[i,:] = softmax_j over this graph's valid columns
# One grid step = one row-tile of one graph's block, so work/traffic is
# G*kb^2 ~ sum(k_g^2) instead of K_total^2.  The pad mask is an additive
# column bias (0 valid / -1e30 pad): padded columns underflow to exactly 0 in
# exp, and every valid row keeps >= 1 valid column (its own diagonal), so no
# mask multiply is needed.  Padded rows compute garbage and are sliced away.
# --------------------------------------------------------------------------
def _attn_softmax_kernel(u_ref, v_ref, cb_ref, ind_ref, out_ref, *,
                         negative_slop, lamb):
    s = u_ref[...] + v_ref[...]                                 # (tm, kb)
    w = jnp.where(s >= 0, s, negative_slop * s)                 # leaky_relu
    w = w + ind_ref[...].astype(jnp.float32) * lamb
    wm = w + cb_ref[...]                                        # pad cols -> -1e30
    row_max = jnp.max(wm, axis=-1, keepdims=True)
    e = jnp.exp(wm - row_max)
    denom = jnp.sum(e, axis=-1, keepdims=True)                  # >= 1 always
    out_ref[...] = e * pl.reciprocal(denom, approx=True)        # EUP, not kb divides


def structure_learning_attention(u_blocks, v_blocks, col_bias, ind_blocks,
                                 negative_slop, lamb):
    num_graphs, kb, _ = ind_blocks.shape
    budget = _vmem_budget()

    def vmem_bytes(tm):
        return (2 * tm * 4 + 4 * kb * 4          # u tile; v + col-bias rows
                + 2 * tm * kb * 2                # induced-attr tile (bf16)
                + 2 * tm * kb * 4                # output tile
                + 3 * tm * kb * 4)               # f32 temporaries
    tm = _pick_row_tile(kb, vmem_bytes, budget)

    kernel = partial(_attn_softmax_kernel,
                     negative_slop=float(negative_slop), lamb=float(lamb))
    return pl.pallas_call(
        kernel,
        out_shape=jax.ShapeDtypeStruct((num_graphs, kb, kb), jnp.float32),
        grid=(num_graphs, kb // tm),
        in_specs=[
            pl.BlockSpec((None, tm, 1), lambda g, i: (g, i, 0)),
            pl.BlockSpec((None, 1, kb), lambda g, i: (g, 0, 0)),
            pl.BlockSpec((None, 1, kb), lambda g, i: (g, 0, 0)),
            pl.BlockSpec((None, tm, kb), lambda g, i: (g, i, 0)),
        ],
        out_specs=pl.BlockSpec((None, tm, kb), lambda g, i: (g, i, 0)),
        compiler_params=pltpu.CompilerParams(
            dimension_semantics=("parallel", "parallel"),
            vmem_limit_bytes=budget),
    )(u_blocks, v_blocks, col_bias, ind_blocks)


# --------------------------------------------------------------------------
# HGPSLPool forward (JAX/Pallas port; sl=True, sample=False, sparse=False)
# --------------------------------------------------------------------------
class HGPSLPool:
    def __init__(self, in_channels, ratio=0.8, lamb=1.0, negative_slop=0.2,
                 key=None):
        self.in_channels = in_channels
        self.ratio = ratio
        self.lamb = lamb
        self.negative_slop = negative_slop
        # xavier_uniform_ for a (1, 2C) parameter
        bound = math.sqrt(6.0 / (1 + 2 * in_channels))
        self.att = jax.random.uniform(key, (1, 2 * in_channels), jnp.float32,
                                      -bound, bound)

    def __call__(self, x, edge_index, edge_attr, batch_counts):
        n, c = x.shape
        row, col = edge_index[0], edge_index[1]
        w = edge_attr.astype(jnp.float32)

        # ---- normalized adjacency, built transposed, already padded and in
        # the kernel-1 streaming dtype (bf16):
        #   AT[row, col] = A_norm[col, row] = d_row^-1/2 * w * d_col^-1/2
        # NodeInformationScore propagation is I - A_norm; the identity is
        # folded into kernel 1 (y = x - A_norm @ x).
        # TODO(synk): assumes the input edge list has no explicit self-loops
        # (matches add_remaining_self_loops semantics only in that case).
        # TODO(synk): the A_norm stream could drop to fp8 on v7x / int8 on
        # v5e-v6e for ~2x on kernel 1; kept bf16 so per-graph top-k node
        # ranking stays close to the f32 reference.
        n_p = _round_up(max(n, 128), 128)
        c_p = _round_up(max(c, 128), 128)
        deg = jnp.zeros((n,), jnp.float32).at[row].add(w)
        deg_inv_sqrt = jnp.where(deg > 0, deg ** -0.5, 0.0)
        vals = deg_inv_sqrt[row] * w * deg_inv_sqrt[col]
        at_pad = jnp.zeros((n_p, n_p), jnp.bfloat16).at[row, col].add(
            vals.astype(jnp.bfloat16))
        xt_pad = jnp.zeros((c_p, n_p), jnp.bfloat16).at[:c, :n].set(
            x.T.astype(jnp.bfloat16))
        score = node_information_score(at_pad, xt_pad)[:n]     # Pallas kernel 1

        # ---- topk(score, ratio, batch): per-graph descending sort
        # TODO(synk): topk / dense_to_sparse are data-dependent-shape graph
        # ops; kept as static-count host/XLA glue rather than Pallas kernels.
        perms, ks, start = [], [], 0
        for ng in batch_counts:
            kg = int(math.ceil(self.ratio * ng))
            ks.append(kg)
            seg = score[start:start + ng]
            order = jnp.argsort(-seg)
            perms.append(order[:kg] + start)
            start += ng
        perm = jnp.concatenate(perms)

        batch = jnp.concatenate([jnp.full((ng,), g, jnp.int32)
                                 for g, ng in enumerate(batch_counts)])
        x_pool = x[perm]
        batch_pool = batch[perm]

        # ---- per-graph block inputs for the attention kernel.
        # s[i,j] = u_i + v_j is separable, so both matvecs are hoisted here.
        att_l = self.att[0, :c]
        att_r = self.att[0, c:]
        u = x_pool @ att_l
        v = x_pool @ att_r
        a_attr = jnp.zeros((n, n), jnp.float32).at[row, col].add(w)

        num_graphs = len(ks)
        kb = _round_up(max(max(ks), 1), 128)
        u_blocks = jnp.zeros((num_graphs, kb, 1), jnp.float32)
        v_blocks = jnp.zeros((num_graphs, 1, kb), jnp.float32)
        col_bias = jnp.full((num_graphs, 1, kb), -1e30, jnp.float32)
        ind_blocks = jnp.zeros((num_graphs, kb, kb), jnp.bfloat16)
        off = 0
        for g, kg in enumerate(ks):
            perm_g = perm[off:off + kg]
            u_blocks = u_blocks.at[g, :kg, 0].set(u[off:off + kg])
            v_blocks = v_blocks.at[g, 0, :kg].set(v[off:off + kg])
            col_bias = col_bias.at[g, 0, :kg].set(0.0)
            ind_blocks = ind_blocks.at[g, :kg, :kg].set(
                a_attr[perm_g][:, perm_g].astype(jnp.bfloat16))
            off += kg

        # ---- attention weights + per-row softmax          (Pallas kernel 2)
        w_blocks = structure_learning_attention(
            u_blocks, v_blocks, col_bias, ind_blocks,
            self.negative_slop, self.lamb)

        # ---- dense_to_sparse over the block-diagonal support (row-major)
        rows_l, cols_l, g_l, li_l, lj_l, off = [], [], [], [], [], 0
        for g, kg in enumerate(ks):
            ii = jnp.arange(kg, dtype=jnp.int32)
            li = jnp.repeat(ii, kg)
            lj = jnp.tile(ii, kg)
            rows_l.append(li + off)
            cols_l.append(lj + off)
            g_l.append(jnp.full((kg * kg,), g, jnp.int32))
            li_l.append(li)
            lj_l.append(lj)
            off += kg
        new_edge_index = jnp.stack([jnp.concatenate(rows_l),
                                    jnp.concatenate(cols_l)], axis=0)
        new_edge_attr = w_blocks[jnp.concatenate(g_l),
                                 jnp.concatenate(li_l),
                                 jnp.concatenate(lj_l)]

        return x_pool, new_edge_index, new_edge_attr, batch_pool


if __name__ == "__main__":
    key = jax.random.PRNGKey(0)
    k_att, k_x, k_w = jax.random.split(key, 3)

    in_channels = 16
    batch_counts = [7, 5]              # graph 0: nodes 0..6, graph 1: nodes 7..11
    n_nodes = sum(batch_counts)

    # small undirected graphs (both directions listed), no self-loops, no duplicates
    und_edges = [(0, 1), (1, 2), (2, 3), (3, 4), (4, 5), (5, 6), (0, 6),
                 (7, 8), (8, 9), (9, 10), (10, 11), (7, 11)]
    src, dst = [], []
    for a, b in und_edges:
        src += [a, b]
        dst += [b, a]
    edge_index = jnp.asarray([src, dst], dtype=jnp.int32)          # (2, 24)
    edge_attr = jax.random.uniform(k_w, (edge_index.shape[1],), jnp.float32,
                                   0.5, 1.5)
    x = jax.random.normal(k_x, (n_nodes, in_channels), jnp.float32)

    pool = HGPSLPool(in_channels, ratio=0.8, lamb=1.0, negative_slop=0.2,
                     key=k_att)
    x_out, new_edge_index, new_edge_attr, batch_out = pool(
        x, edge_index, edge_attr, batch_counts)
    jax.block_until_ready((x_out, new_edge_index, new_edge_attr, batch_out))
    print("KERNEL_OK")
</pallas_src>

<mosaic_0001>
module attributes {stable_mosaic.version = 11 : i64} {
  func.func @_info_score_kernel(%arg0: i32, %arg1: memref<128x128xbf16, #tpu.memory_space<vmem>>, %arg2: memref<128x128xbf16, #tpu.memory_space<vmem>>, %arg3: memref<1x128xf32, #tpu.memory_space<vmem>>) attributes {dimension_semantics = [#tpu.dimension_semantics<parallel>], iteration_bounds = array<i64: 1>, scalar_prefetch = 0 : i64, scratch_operands = 0 : i64, tpu.core_type = #tpu.core_type<tc>, window_params = [{transform_indices = @transform_0, window_bounds = array<i64: 128, 128>}, {pipeline_mode = #tpu.pipeline_mode<synchronous>, transform_indices = @transform_1, window_bounds = array<i64: 128, 128>}, {transform_indices = @transform_2, window_bounds = array<i64: 1, 128>}]} {
    %c0 = arith.constant 0 : index
    %c0_0 = arith.constant 0 : index
    %0 = vector.load %arg2[%c0, %c0_0] : memref<128x128xbf16, #tpu.memory_space<vmem>>, vector<128x128xbf16>
    %c0_1 = arith.constant 0 : index
    %c0_2 = arith.constant 0 : index
    %1 = vector.load %arg1[%c0_1, %c0_2] : memref<128x128xbf16, #tpu.memory_space<vmem>>, vector<128x128xbf16>
    %cst = arith.constant dense<0.000000e+00> : vector<128x128xf32>
    %2 = tpu.matmul %0, %1, %cst {dimension_numbers = #tpu.dot_dimension_numbers<[1], [0], [0], [1], [0, 0, 1, 1], [], []>} : vector<128x128xbf16>, vector<128x128xbf16>, vector<128x128xf32> -> vector<128x128xf32>
    %c128_i32 = arith.constant 128 : i32
    %3 = arith.muli %arg0, %c128_i32 : i32
    %4 = tpu.assume_multiple %3, 128 : i32
    %c0_3 = arith.constant 0 : index
    %5 = arith.index_cast %4 : i32 to index
    %6 = vector.load %arg2[%c0_3, %5] : memref<128x128xbf16, #tpu.memory_space<vmem>>, vector<128x128xbf16>
    %7 = arith.extf %6 : vector<128x128xbf16> to vector<128x128xf32>
    %8 = arith.subf %7, %2 : vector<128x128xf32>
    %9 = math.absf %8 : vector<128x128xf32>
    %cst_4 = arith.constant dense<0.000000e+00> : vector<128xf32>
    %10 = vector.multi_reduction <add>, %9, %cst_4 [0] : vector<128x128xf32> to vector<128xf32>
    %11 = vector.shape_cast %10 : vector<128xf32> to vector<1x128xf32>
    %c0_5 = arith.constant 0 : index
    %c0_6 = arith.constant 0 : index
    %12 = vector.load %arg3[%c0_5, %c0_6] : memref<1x128xf32, #tpu.memory_space<vmem>>, vector<1x128xf32>
    tpu.vector_store %arg3[%c0_5, %c0_6], %11 {strides = array<i32>} : memref<1x128xf32, #tpu.memory_space<vmem>>, vector<1x128xf32>,
    return
  }
  func.func @transform_0(%arg0: i32) -> (i32, i32) {
    %c0_i32 = arith.constant 0 : i32
    %c0_i32_0 = arith.constant 0 : i32
    return %c0_i32, %arg0 : i32, i32
  }
  func.func @transform_1(%arg0: i32) -> (i32, i32) {
    %c0_i32 = arith.constant 0 : i32
    %c0_i32_0 = arith.constant 0 : i32
    %c0_i32_1 = arith.constant 0 : i32
    return %c0_i32, %c0_i32_0 : i32, i32
  }
  func.func @transform_2(%arg0: i32) -> (i32, i32) {
    %c0_i32 = arith.constant 0 : i32
    %c0_i32_0 = arith.constant 0 : i32
    return %c0_i32, %arg0 : i32, i32
  }
}

</mosaic_0001>

<bundles_post_ra>
// kernel: tpu_custom_call.1
= control target key start
LH: loop header
LB: loop body
LE: loop exit
PB: predicated region body
PF: predicated region fallthrough
CT: control target
= control target key end

     0   :  { %7 = vsyncpa [#allocation3], 0  ;;  %s643_s0 = inlined_call_operand.hbm [shape: bf16[128,128], index: 0, kind: input, shape index: {}]   ;;  %s644_s1 = inlined_call_operand.hbm [shape: bf16[128,128], index: 1, kind: input, shape index: {}]   ;;  %s645_s2 = inlined_call_operand.hbm [shape: f32[1,128], index: 2, kind: output, shape index: {}]  }
   0x1   :  { %8 = vsyncpa [#allocation6], 0 }
   0x2   :  { %9 = vsyncpa [#allocation4], 0  ;;  %s587_s9 = smov [#allocation2]   ;;  %s515_s13 = scalar_lea.hbm %s643_s0, 1024 }
   0x3   :  { %s15_s10 = sshll.u32 %s587_s9, 4  ;;  %p516_p0 = scmp.ne.s32.totalorder %s643_s0, %s515_s13  ;;  %s16_s10 = int_to_ptr.vmem [resolvable:$true] %s15_s10 }
   0x4   :  { %p519_p1 = scmp.lt.u32.totalorder %s515_s13, %s643_s0 }
   0x6   :  { %p521_p2 = pnand %p519_p1, %p516_p0 }
   0x8   :  { %524 = shalt.err (!%p521_p2)
}
   0x9   :  { %s525_s18 = scalar_lea.vmem %s16_s10, 1024  ;;  %p530_p4 = scmp.lt.s32.totalorder %s16_s10, %s16_s10 }
   0xa   :  { %p526_p3 = scmp.ne.s32.totalorder %s16_s10, %s525_s18  ;;  %p531_p5 = scmp.lt.s32.totalorder %s525_s18, %s525_s18 }
   0xc   :  { %p532_p6 = por %p531_p5, %p530_p4 }
   0xe   :  { %p533_p7 = pnand %p532_p6, %p526_p3 }
  0x10   :  { %536 = shalt.err (!%p533_p7)
}
  0x11   :  { %s588_s19 = smov 64   ;;  %s589_s20 = smov 4  }
  0x12   :  { %21 = dma.hbm_to_vmem [thread:$0]  %s643_s0, 1024, %s16_s10, [#allocation3], %s588_s19, %s588_s19, %s589_s20  }
  0x13   :  { %s590_s23 = smov [#allocation5]   ;;  %s537_s27 = scalar_lea.hbm %s644_s1, 1024 }
  0x14   :  { %s27_s24 = sshll.u32 %s590_s23, 4  ;;  %p538_p8 = scmp.ne.s32.totalorder %s644_s1, %s537_s27  ;;  %s28_s24 = int_to_ptr.vmem [resolvable:$true] %s27_s24 }
  0x15   :  { %p541_p9 = scmp.lt.u32.totalorder %s537_s27, %s644_s1 }
  0x17   :  { %p543_p10 = pnand %p541_p9, %p538_p8 }
  0x19   :  { %546 = shalt.err (!%p543_p10)
}
  0x1a   :  { %s547_s4 = scalar_lea.vmem %s28_s24, 1024  ;;  %p552_p12 = scmp.lt.s32.totalorder %s28_s24, %s28_s24 }
  0x1b   :  { %p548_p11 = scmp.ne.s32.totalorder %s28_s24, %s547_s4  ;;  %p553_p13 = scmp.lt.s32.totalorder %s547_s4, %s547_s4 }
  0x1d   :  { %p554_p0 = por %p553_p13, %p552_p12 }
  0x1f   :  { %p555_p1 = pnand %p554_p0, %p548_p11 }
  0x21   :  { %558 = shalt.err (!%p555_p1)
}
  0x22   :  { %33 = dma.hbm_to_vmem [thread:$0]  %s644_s1, 1024, %s28_s24, [#allocation6], %s588_s19, %s588_s19, %s589_s20  }
  0x23   :  { %581 = dma.done.wait [#allocation3], 1024  }
  0x24   :  { %582 = vsyncadd [#allocation3], 4294966272 }
  0x25   :  { %583 = dma.done.wait [#allocation6], 1024  }
  0x26   :  { %584 = vsyncadd [#allocation6], 4294966272  ;;  %v499_v0 = vld [vmem:[#allocation2] sm:$0xff]   ;;  %v500_v1 = vld [vmem:[#allocation2 + $0x8] sm:$0xff]   ;;  %s591_s1 = smov [#allocation7]  }
  0x27   :  { %446 = vmatprep.subr.bf16.mxu0 %v499_v0  ;;  %478 = vmatprep.subr.bf16.mxu1 %v499_v0  ;;  %v501_v2 = vld [vmem:[#allocation2 + $0x10] sm:$0xff]   ;;  %v502_v3 = vld [vmem:[#allocation2 + $0x18] sm:$0xff]   ;;  %v507_v4 = vld [vmem:[#allocation5] sm:$0xff]   ;;  %s363_s6 = sshll.u32 %s591_s1, 4  ;;  %s364_s6 = int_to_ptr.vmem [resolvable:$true] %s363_s6 }
  0x28   :  { %447 = vmatpush3.bf16.msra.mxu0 %v499_v0  ;;  %486 = vmatpush3.bf16.msra.mxu1 %v499_v0  ;;  %v503_v5 = vld [vmem:[#allocation2 + $0x20] sm:$0xff]   ;;  %v504_v7 = vld [vmem:[#allocation2 + $0x28] sm:$0xff]   ;;  %v505_v8 = vld [vmem:[#allocation2 + $0x30] sm:$0xff]   ;;  %s559_s7 = scalar_lea.vmem %s364_s6, 16  ;;  %s563_s8 = scalar_lea.vmem %s364_s6, 32 }
  0x29   :  { %448 = vmatprep.subr.bf16.mxu0 %v500_v1  ;;  %479 = vmatprep.subr.bf16.mxu1 %v500_v1  ;;  %v511_v6 = vld [vmem:[#allocation5 + $0x20] sm:$0xff]   ;;  %v506_v9 = vld [vmem:[#allocation2 + $0x38] sm:$0xff]   ;;  %v508_v10 = vld [vmem:[#allocation5 + $0x8] sm:$0xff]   ;;  %p560_p2 = scmp.ne.s32.totalorder %s364_s6, %s559_s7  ;;  %p564_p3 = scmp.lt.s32.totalorder %s364_s6, %s364_s6 }
  0x2a   :  { %462 = vmatprep.mubr.bf16.mxu0 %v507_v4  ;;  %470 = vmatprep.mubr.bf16.mxu1 %v511_v6  ;;  %v512_v11 = vld [vmem:[#allocation5 + $0x28] sm:$0xff]   ;;  %v509_v12 = vld [vmem:[#allocation5 + $0x10] sm:$0xff]   ;;  %v510_v14 = vld [vmem:[#allocation5 + $0x18] sm:$0xff]   ;;  %p565_p4 = scmp.lt.s32.totalorder %s563_s8, %s559_s7 }
  0x2b   :  { %v513_v13 = vld [vmem:[#allocation5 + $0x30] sm:$0xff]   ;;  %v514_v15 = vld [vmem:[#allocation5 + $0x38] sm:$0xff]   ;;  %v392_v16 = vld [vmem:[#allocation5] sm:$0xff]  }
  0x2c   :  { %449 = vmatpush3.bf16.msra.mxu0 %v500_v1  ;;  %487 = vmatpush3.bf16.msra.mxu1 %v500_v1  ;;  %v423_v17 = vld [vmem:[#allocation5 + $0x8] sm:$0xff]   ;;  %v393_v18 = vunpack.c.l.bf16 %v392_v16  ;;  %v394_v21 = vunpack.c.h.bf16 %v392_v16  ;;  %v424_v30 = vld [vmem:[#allocation5 + $0x10] sm:$0xff]   ;;  %v425_v34 = vld [vmem:[#allocation5 + $0x18] sm:$0xff]   ;;  %p566_p5 = por %p565_p4, %p564_p3 }
  0x2d   :  { %450 = vmatprep.subr.bf16.mxu0 %v501_v2  ;;  %480 = vmatprep.subr.bf16.mxu1 %v501_v2  ;;  %v397_v20 = vunpack.c.l.bf16 %v423_v17  ;;  %v398_v27 = vunpack.c.h.bf16 %v423_v17  ;;  %v401_v38 = vunpack.c.l.bf16 %v424_v30  ;;  %v426_v39 = vld [vmem:[#allocation5 + $0x20] sm:$0xff]   ;;  %v405_v43 = vunpack.c.l.bf16 %v425_v34  ;;  %v427_v61 = vld [vmem:[#allocation5 + $0x28] sm:$0xff]  }
  0x2e   :  { %v402_v44 = vunpack.c.h.bf16 %v424_v30  ;;  %v406_v47 = vunpack.c.h.bf16 %v425_v34  ;;  %v409_v53 = vunpack.c.l.bf16 %v426_v39  ;;  %v410_v62 = vunpack.c.h.bf16 %v426_v39  ;;  %p567_p6 = pnand %p566_p5, %p560_p2 }
  0x2f   :  { %v413_v6 = vunpack.c.l.bf16 %v427_v61 }
  0x30   :  { %451 = vmatpush3.bf16.msra.mxu0 %v501_v2  ;;  %488 = vmatpush3.bf16.msra.mxu1 %v501_v2 }
  0x31   :  { %452 = vmatprep.subr.bf16.mxu0 %v502_v3  ;;  %481 = vmatprep.subr.bf16.mxu1 %v502_v3 }
  0x34   :  { %453 = vmatpush3.bf16.msra.mxu0 %v502_v3  ;;  %489 = vmatpush3.bf16.msra.mxu1 %v502_v3  ;;  %v428_v3 = vld [vmem:[#allocation5 + $0x30] sm:$0xff]  }
  0x35   :  { %454 = vmatprep.subr.bf16.mxu0 %v503_v5  ;;  %482 = vmatprep.subr.bf16.mxu1 %v503_v5  ;;  %v418_v16 = vunpack.c.h.bf16 %v428_v3 }
  0x38   :  { %455 = vmatpush3.bf16.msra.mxu0 %v503_v5  ;;  %490 = vmatpush3.bf16.msra.mxu1 %v503_v5 }
  0x39   :  { %456 = vmatprep.subr.bf16.mxu0 %v504_v7  ;;  %483 = vmatprep.subr.bf16.mxu1 %v504_v7 }
  0x3c   :  { %457 = vmatpush3.bf16.msra.mxu0 %v504_v7  ;;  %491 = vmatpush3.bf16.msra.mxu1 %v504_v7  ;;  %v414_v7 = vunpack.c.h.bf16 %v427_v61 }
  0x3d   :  { %458 = vmatprep.subr.bf16.mxu0 %v505_v8  ;;  %484 = vmatprep.subr.bf16.mxu1 %v505_v8 }
  0x40   :  { %459 = vmatpush3.bf16.msra.mxu0 %v505_v8  ;;  %492 = vmatpush3.bf16.msra.mxu1 %v505_v8  ;;  %v417_v8 = vunpack.c.l.bf16 %v428_v3 }
  0x41   :  { %460 = vmatprep.subr.bf16.mxu0 %v506_v9  ;;  %485 = vmatprep.subr.bf16.mxu1 %v506_v9 }
  0x44   :  { %461 = vmatpush3.bf16.msra.mxu0 %v506_v9  ;;  %493 = vmatpush3.bf16.msra.mxu1 %v506_v9 }
  0x47   :  { %463 = vmatmul.mubr.bf16.vlgmr.msra.gmra.mrb[0].mxu0 %v508_v10  ;;  %471 = vmatmul.mubr.bf16.vlgmr.msra.gmra.mrb[0].mxu1 %v512_v11 }
  0x48   :  { %466 = vmatprep.mubr.bf16.mxu0 %v509_v12  ;;  %474 = vmatprep.mubr.bf16.mxu1 %v513_v13 }
  0x4f   :  { %467 = vmatmul.mubr.bf16.gmra.mrb[4].mxu0 %v510_v14  ;;  %475 = vmatmul.mubr.bf16.gmra.mrb[4].mxu1 %v514_v15  ;;  %v429_v15 = vld [vmem:[#allocation5 + $0x38] sm:$0xff]  }
 0x11a   :  { %v464_v19 = vpop.f32.mrb[0].mxu0  ;;  %v472_v22 = vpop.f32.mrb[0].mxu1 }
 0x11b   :  { %v203_v23 = vpop.f32.mrb[1].mxu0  ;;  %v235_v24 = vpop.f32.mrb[1].mxu1  ;;  %v305_v32 = vsub.f32 %v397_v20, %v464_v19  ;;  %v313_v13 = vsub.f32 %v413_v6, %v472_v22 }
 0x11c   :  { %v303_v25 = vsub.f32 %v393_v18, %v203_v23  ;;  %v465_v26 = vpop.f32.mrb[2].mxu0  ;;  %v473_v28 = vpop.f32.mrb[2].mxu1  ;;  %v311_v2 = vsub.f32 %v409_v53, %v235_v24  ;;  %v421_v24 = vunpack.c.l.bf16 %v429_v15 }
 0x11d   :  { %v206_v29 = vpop.f32.mrb[3].mxu0  ;;  %v238_v31 = vpop.f32.mrb[3].mxu1  ;;  %v306_v36 = vsub.f32 %v398_v27, %v465_v26  ;;  %v321_v40 = vand.u32 2147483647, %v305_v32  ;;  %v314_v18 = vsub.f32 %v414_v7, %v473_v28 }
 0x11e   :  { %v304_v33 = vsub.f32 %v394_v21, %v206_v29  ;;  %v319_v35 = vand.u32 2147483647, %v303_v25  ;;  %v327_v11 = vand.u32 2147483647, %v311_v2  ;;  %v312_v12 = vsub.f32 %v410_v62, %v238_v31 }
 0x11f   :  { %v322_v49 = vand.u32 2147483647, %v306_v36  ;;  %v329_v21 = vand.u32 2147483647, %v313_v13  ;;  %v422_v25 = vunpack.c.h.bf16 %v429_v15  ;;  %v330_v26 = vand.u32 2147483647, %v314_v18 }
 0x120   :  { %v320_v37 = vand.u32 2147483647, %v304_v33  ;;  %v328_v19 = vand.u32 2147483647, %v312_v12 }
 0x122   :  { %v335_v41 = vadd.f32 %v320_v37, %v319_v35  ;;  %v468_v42 = vpop.f32.mrb[4].mxu0  ;;  %v476_v45 = vpop.f32.mrb[4].mxu1 }
 0x123   :  { %v219_v46 = vpop.f32.mrb[5].mxu0  ;;  %v251_v48 = vpop.f32.mrb[5].mxu1  ;;  %v309_v57 = vsub.f32 %v405_v43, %v468_v42  ;;  %v317_v32 = vsub.f32 %v421_v24, %v476_v45 }
 0x124   :  { %v336_v50 = vadd.f32 %v335_v41, %v321_v40  ;;  %v307_v51 = vsub.f32 %v401_v38, %v219_v46  ;;  %v469_v52 = vpop.f32.mrb[6].mxu0  ;;  %v477_v54 = vpop.f32.mrb[6].mxu1  ;;  %v315_v20 = vsub.f32 %v417_v8, %v251_v48 }
 0x125   :  { %v222_v55 = vpop.f32.mrb[7].mxu0  ;;  %v254_v56 = vpop.f32.mrb[7].mxu1  ;;  %v310_v0 = vsub.f32 %v406_v47, %v469_v52  ;;  %v325_v4 = vand.u32 2147483647, %v309_v57  ;;  %v318_v31 = vsub.f32 %v422_v25, %v477_v54  ;;  %v333_v35 = vand.u32 2147483647, %v317_v32 }
 0x126   :  { %v323_v58 = vand.u32 2147483647, %v307_v51  ;;  %v337_v59 = vadd.f32 %v336_v50, %v322_v49  ;;  %v308_v60 = vsub.f32 %v402_v44, %v222_v55  ;;  %v331_v29 = vand.u32 2147483647, %v315_v20 }
 0x127   :  { %v326_v9 = vand.u32 2147483647, %v310_v0  ;;  %v316_v30 = vsub.f32 %v418_v16, %v254_v56  ;;  %v334_v37 = vand.u32 2147483647, %v318_v31 }
 0x128   :  { %v338_v63 = vadd.f32 %v337_v59, %v323_v58  ;;  %v324_v1 = vand.u32 2147483647, %v308_v60 }
 0x129   :  { %v332_v22 = vand.u32 2147483647, %v316_v30 }
 0x12a   :  { %v339_v5 = vadd.f32 %v338_v63, %v324_v1 }
 0x12c   :  { %v340_v10 = vadd.f32 %v339_v5, %v325_v4 }
 0x12e   :  { %v341_v14 = vadd.f32 %v340_v10, %v326_v9 }
 0x130   :  { %v342_v17 = vadd.f32 %v341_v14, %v327_v11 }
 0x132   :  { %v343_v23 = vadd.f32 %v342_v17, %v328_v19 }
 0x134   :  { %v344_v27 = vadd.f32 %v343_v23, %v329_v21 }
 0x136   :  { %v345_v33 = vadd.f32 %v344_v27, %v330_v26 }
 0x138   :  { %v346_v34 = vadd.f32 %v345_v33, %v331_v29 }
 0x13a   :  { %v347_v36 = vadd.f32 %v346_v34, %v332_v22 }
 0x13c   :  { %v348_v38 = vadd.f32 %v347_v36, %v333_v35 }
 0x13e   :  { %v349_v28 = vadd.f32 %v348_v38, %v334_v37 }
 0x140   :  { %v350_v39 = vrot.slane %v349_v28, 4 }
 0x142   :  { %v351_v40 = vadd.f32 %v350_v39, %v349_v28 }
 0x144   :  { %v352_v41 = vrot.slane %v351_v40, 2 }
 0x146   :  { %v353_v42 = vadd.f32 %v352_v41, %v351_v40 }
 0x148   :  { %v354_v43 = vrot.slane %v353_v42, 1 }
 0x14a   :  { %v355_v44 = vadd.f32 %v354_v43, %v353_v42 }
 0x14c   :  { %356 = vst [vmem:[#allocation7] sm:$0x1] %v355_v44 }
 0x14d   :  { %570 = shalt.err (!%p567_p6)
}
 0x14e   :  { %s571_s11 = scalar_lea.hbm %s645_s2, 16 }
 0x14f   :  { %p572_p7 = scmp.ne.s32.totalorder %s645_s2, %s571_s11  ;;  %p575_p8 = scmp.lt.u32.totalorder %s571_s11, %s645_s2 }
 0x151   :  { %p577_p9 = pnand %p575_p8, %p572_p7 }
 0x153   :  { %580 = shalt.err (!%p577_p9)
}
 0x154   :  { %366 = dma.vmem_to_hbm [thread:$0]  %s364_s6, 16, %s645_s2, [#allocation4]  }
 0x155   :  { %585 = dma.done.wait [#allocation4], 16  }
 0x156   :  { %586 = vsyncadd [#allocation4], 4294967280 }
 0x157   :  { %370 = vsyncpa [#allocation3], 1 }
 0x158   :  { %371 = vsyncpa [#allocation6], 1 }
 0x159   :  { %372 = vsyncpa [#allocation4], 1 }

</bundles_post_ra>
